<compile_context>
chip_gen: v7x
topology: tpu7x:2x2x1
jax: 0.10.0
libtpu: 0.0.40
codegen_flags: <defaults>
</compile_context>

<pallas_src>
import functools
import math

import jax
import jax.numpy as jnp
from jax.experimental import pallas as pl
from jax.experimental.pallas import tpu as pltpu


def _cdiv(a, b):
    return (a + b - 1) // b


def _vmem_tile_budget_bytes():
    """Per-block byte budget, derived from the chip's VMEM capacity.

    ~1/16 of capacity, clamped to the 1-4 MiB sweet spot where the mem-bound
    curve is flat: 4 MiB on v5e/v6e (128 MiB VMEM) and 4 MiB on v7x (64 MiB),
    so 2x(in)+2x(out) double-buffering stays ~16 MiB, inside every
    generation's scoped limit.
    """
    try:
        cap = pltpu.get_tpu_info().vmem_capacity_bytes
    except Exception:
        cap = 64 << 20  # conservative (v7x per-core) fallback
    return max(1 << 20, min(4 << 20, cap // 16))


def _pick_tile(extent, unit_bytes, align, budget_bytes,
               min_grid_steps=8, other_steps=1, min_tile_bytes=64 << 10):
    """Pick a tile length along one axis.

    The returned tile is either a multiple of `align` or the full extent
    (both always legal); the grid uses cdiv so Pallas handles the ragged
    last block.  Tiles are shrunk (never below `align`, never below
    `min_tile_bytes`) when the total grid would otherwise have too few steps
    to feed both v7x TensorCores / the double-buffered DMA pipeline.
    """
    unit_bytes = max(int(unit_bytes), 1)
    if extent <= align:
        return extent                                   # full-extent block
    t = (budget_bytes // unit_bytes) // align * align
    t = max(align, t)
    if t >= extent:
        t = extent                                      # whole axis fits
    while (other_steps * _cdiv(extent, t) < min_grid_steps
           and t > align
           and t * unit_bytes > min_tile_bytes):
        t = max(align, (t // 2) // align * align)
    return t


# ----------------------------- kernels ------------------------------------ #

def _ln_channels_first_kernel(x_ref, w_ref, b_ref, o_ref, *, eps):
    # x_ref: (1, C, TL) tile of the (B, C, H*W) view.  Reduction over the
    # channel axis; TL (multiple of 128) sits on the lane axis -> lane-dense
    # loads/stores.  Two-pass centered variance matches torch numerics.
    x = x_ref[...].astype(jnp.float32)
    u = jnp.mean(x, axis=1, keepdims=True)              # (1, 1, TL)
    d = x - u
    s = jnp.mean(d * d, axis=1, keepdims=True)          # biased var (torch)
    y = d * jax.lax.rsqrt(s + eps)                      # EUP rsqrt, no divide
    # w_ref/b_ref: (1, C, 1) -> broadcast along the lane axis.
    o_ref[...] = (y * w_ref[...] + b_ref[...]).astype(o_ref.dtype)


def _ln_channels_last_kernel(x_ref, w_ref, b_ref, o_ref, *, eps):
    # x_ref: (TR, C) tile; reduction over the lane (minor) axis.
    x = x_ref[...].astype(jnp.float32)
    u = jnp.mean(x, axis=-1, keepdims=True)             # (TR, 1)
    d = x - u
    s = jnp.mean(d * d, axis=-1, keepdims=True)
    y = d * jax.lax.rsqrt(s + eps)
    o_ref[...] = (y * w_ref[...] + b_ref[...]).astype(o_ref.dtype)


# ----------------------------- wrappers ----------------------------------- #

def layer_norm_channels_first(x, weight, bias, eps):
    assert x.ndim == 4, "channels_first LayerNorm expects (B, C, H, W)"
    B, C, H, W = x.shape
    HW = H * W
    x3 = x.reshape(B, C, HW)                    # row-major flatten: layout no-op
    budget = _vmem_tile_budget_bytes()
    tl = _pick_tile(HW, C * x.dtype.itemsize, 128, budget,
                    min_grid_steps=8, other_steps=B)
    grid = (B, _cdiv(HW, tl))
    w3 = weight.reshape(1, C, 1).astype(jnp.float32)
    b3 = bias.reshape(1, C, 1).astype(jnp.float32)
    kern = functools.partial(_ln_channels_first_kernel, eps=float(eps))
    cost = pl.CostEstimate(
        flops=int(10 * x.size),
        transcendentals=int(B * HW),
        bytes_accessed=int(2 * x.size * x.dtype.itemsize))
    out3 = pl.pallas_call(
        kern,
        out_shape=jax.ShapeDtypeStruct((B, C, HW), x.dtype),
        grid_spec=pltpu.PrefetchScalarGridSpec(
            num_scalar_prefetch=0,
            grid=grid,
            in_specs=[
                pl.BlockSpec((1, C, tl), lambda b, l: (b, 0, l)),
                pl.BlockSpec((1, C, 1), lambda b, l: (0, 0, 0)),
                pl.BlockSpec((1, C, 1), lambda b, l: (0, 0, 0)),
            ],
            out_specs=pl.BlockSpec((1, C, tl), lambda b, l: (b, 0, l)),
        ),
        compiler_params=pltpu.CompilerParams(
            dimension_semantics=("parallel", "parallel"),
            vmem_limit_bytes=32 << 20),
        cost_estimate=cost,
    )(x3, w3, b3)
    return out3.reshape(B, C, H, W)


def layer_norm_channels_last(x, weight, bias, eps):
    C = x.shape[-1]
    R = math.prod(x.shape[:-1])
    x2 = x.reshape(R, C)                        # row-major flatten: layout no-op
    # Align the row tile to the dtype's sublane packing (8 f32 / 16 bf16 / 32 i8).
    pack = max(8, 32 // x.dtype.itemsize)
    budget = _vmem_tile_budget_bytes()
    tr = _pick_tile(R, C * x.dtype.itemsize, pack, budget, min_grid_steps=8)
    grid = (_cdiv(R, tr),)
    w2 = weight.reshape(1, C).astype(jnp.float32)
    b2 = bias.reshape(1, C).astype(jnp.float32)
    kern = functools.partial(_ln_channels_last_kernel, eps=float(eps))
    cost = pl.CostEstimate(
        flops=int(10 * x.size),
        transcendentals=int(R),
        bytes_accessed=int(2 * x.size * x.dtype.itemsize))
    out2 = pl.pallas_call(
        kern,
        out_shape=jax.ShapeDtypeStruct((R, C), x.dtype),
        grid_spec=pltpu.PrefetchScalarGridSpec(
            num_scalar_prefetch=0,
            grid=grid,
            in_specs=[
                pl.BlockSpec((tr, C), lambda i: (i, 0)),
                pl.BlockSpec((1, C), lambda i: (0, 0)),
                pl.BlockSpec((1, C), lambda i: (0, 0)),
            ],
            out_specs=pl.BlockSpec((tr, C), lambda i: (i, 0)),
        ),
        compiler_params=pltpu.CompilerParams(
            dimension_semantics=("parallel",),
            vmem_limit_bytes=32 << 20),
        cost_estimate=cost,
    )(x2, w2, b2)
    return out2.reshape(x.shape)


class LayerNormPallas:
    """Pallas equivalent of the PyTorch LayerNorm module."""

    def __init__(self, normalized_shape, eps=1e-6, data_format='channels_first'):
        if data_format not in ('channels_last', 'channels_first'):
            raise NotImplementedError
        self.weight = jnp.ones((normalized_shape,), jnp.float32)
        self.bias = jnp.zeros((normalized_shape,), jnp.float32)
        self.eps = eps
        self.data_format = data_format
        self.normalized_shape = (normalized_shape,)

    def __call__(self, x):
        if self.data_format == 'channels_last':
            return layer_norm_channels_last(x, self.weight, self.bias, self.eps)
        return layer_norm_channels_first(x, self.weight, self.bias, self.eps)


# ----------------------------- references --------------------------------- #

def _ref_channels_first(x, w, b, eps):
    u = x.mean(axis=1, keepdims=True)
    s = ((x - u) ** 2).mean(axis=1, keepdims=True)
    xh = (x - u) / jnp.sqrt(s + eps)
    return w[None, :, None, None] * xh + b[None, :, None, None]


def _ref_channels_last(x, w, b, eps):
    u = x.mean(axis=-1, keepdims=True)
    s = ((x - u) ** 2).mean(axis=-1, keepdims=True)
    return (x - u) / jnp.sqrt(s + eps) * w + b


if __name__ == "__main__":
    key = jax.random.PRNGKey(0)
    B, C, H, W = 2, 4, 16, 16
    k1, k2, k3, k4 = jax.random.split(key, 4)

    # non-trivial affine params so the per-channel scale/shift path is exercised
    weight = 1.0 + 0.1 * jax.random.normal(k2, (C,), jnp.float32)
    bias = 0.1 * jax.random.normal(k3, (C,), jnp.float32)

    # --- channels_first (the module's default) ---
    x_cf = jax.random.normal(k1, (B, C, H, W), jnp.float32)
    ln_cf = LayerNormPallas(C, eps=1e-6, data_format='channels_first')
    ln_cf.weight, ln_cf.bias = weight, bias
    y_cf = jax.block_until_ready(ln_cf(x_cf))
    ref_cf = _ref_channels_first(x_cf, weight, bias, ln_cf.eps)
    assert y_cf.shape == x_cf.shape and y_cf.dtype == x_cf.dtype
    assert float(jnp.max(jnp.abs(y_cf - ref_cf))) < 1e-4, "channels_first mismatch"

    # --- channels_last ---
    x_cl = jax.random.normal(k4, (B, H, W, C), jnp.float32)
    ln_cl = LayerNormPallas(C, eps=1e-6, data_format='channels_last')
    ln_cl.weight, ln_cl.bias = weight, bias
    y_cl = jax.block_until_ready(ln_cl(x_cl))
    ref_cl = _ref_channels_last(x_cl, weight, bias, ln_cl.eps)
    assert y_cl.shape == x_cl.shape and y_cl.dtype == x_cl.dtype
    assert float(jnp.max(jnp.abs(y_cl - ref_cl))) < 1e-4, "channels_last mismatch"

    print("KERNEL_OK")
</pallas_src>

<mosaic_0001>
module attributes {stable_mosaic.version = 11 : i64} {
  func.func @_ln_channels_first_kernel(%arg0: i32, %arg1: i32, %arg2: memref<1x4x256xf32, #tpu.memory_space<vmem>>, %arg3: memref<1x4x1xf32, #tpu.memory_space<vmem>>, %arg4: memref<1x4x1xf32, #tpu.memory_space<vmem>>, %arg5: memref<1x4x256xf32, #tpu.memory_space<vmem>>) attributes {dimension_semantics = [#tpu.dimension_semantics<parallel>, #tpu.dimension_semantics<parallel>], iteration_bounds = array<i64: 2, 1>, scalar_prefetch = 0 : i64, scratch_operands = 0 : i64, tpu.core_type = #tpu.core_type<tc>, window_params = [{transform_indices = @transform_0, window_bounds = array<i64: 1, 4, 256>}, {pipeline_mode = #tpu.pipeline_mode<synchronous>, transform_indices = @transform_1, window_bounds = array<i64: 1, 4, 1>}, {pipeline_mode = #tpu.pipeline_mode<synchronous>, transform_indices = @transform_2, window_bounds = array<i64: 1, 4, 1>}, {transform_indices = @transform_3, window_bounds = array<i64: 1, 4, 256>}]} {
    %c0 = arith.constant 0 : index
    %c0_0 = arith.constant 0 : index
    %c0_1 = arith.constant 0 : index
    %0 = vector.load %arg2[%c0, %c0_0, %c0_1] : memref<1x4x256xf32, #tpu.memory_space<vmem>>, vector<1x4x256xf32>
    %cst = arith.constant dense<0.000000e+00> : vector<1x256xf32>
    %1 = vector.multi_reduction <add>, %0, %cst [1] : vector<1x4x256xf32> to vector<1x256xf32>
    %2 = vector.shape_cast %1 : vector<1x256xf32> to vector<1x1x256xf32>
    %cst_2 = arith.constant 4.000000e+00 : f32
    %3 = vector.broadcast %cst_2 : f32 to vector<1x1x256xf32>
    %4 = arith.divf %2, %3 : vector<1x1x256xf32>
    %5 = vector.broadcast %4 : vector<1x1x256xf32> to vector<1x4x256xf32>
    %6 = arith.subf %0, %5 : vector<1x4x256xf32>
    %7 = arith.mulf %6, %6 : vector<1x4x256xf32>
    %cst_3 = arith.constant dense<0.000000e+00> : vector<1x256xf32>
    %8 = vector.multi_reduction <add>, %7, %cst_3 [1] : vector<1x4x256xf32> to vector<1x256xf32>
    %9 = vector.shape_cast %8 : vector<1x256xf32> to vector<1x1x256xf32>
    %cst_4 = arith.constant 4.000000e+00 : f32
    %10 = vector.broadcast %cst_4 : f32 to vector<1x1x256xf32>
    %11 = arith.divf %9, %10 : vector<1x1x256xf32>
    %cst_5 = arith.constant 9.99999997E-7 : f32
    %12 = vector.broadcast %cst_5 : f32 to vector<1x1x256xf32>
    %13 = arith.addf %11, %12 : vector<1x1x256xf32>
    %14 = math.rsqrt %13 : vector<1x1x256xf32>
    %15 = vector.broadcast %14 : vector<1x1x256xf32> to vector<1x4x256xf32>
    %16 = arith.mulf %6, %15 : vector<1x4x256xf32>
    %c0_6 = arith.constant 0 : index
    %c0_7 = arith.constant 0 : index
    %c0_8 = arith.constant 0 : index
    %17 = vector.load %arg3[%c0_6, %c0_7, %c0_8] : memref<1x4x1xf32, #tpu.memory_space<vmem>>, vector<1x4x1xf32>
    %18 = vector.broadcast %17 : vector<1x4x1xf32> to vector<1x4x256xf32>
    %19 = arith.mulf %16, %18 : vector<1x4x256xf32>
    %c0_9 = arith.constant 0 : index
    %c0_10 = arith.constant 0 : index
    %c0_11 = arith.constant 0 : index
    %20 = vector.load %arg4[%c0_9, %c0_10, %c0_11] : memref<1x4x1xf32, #tpu.memory_space<vmem>>, vector<1x4x1xf32>
    %21 = vector.broadcast %20 : vector<1x4x1xf32> to vector<1x4x256xf32>
    %22 = arith.addf %19, %21 : vector<1x4x256xf32>
    %c0_12 = arith.constant 0 : index
    %c0_13 = arith.constant 0 : index
    %c0_14 = arith.constant 0 : index
    %23 = vector.load %arg5[%c0_12, %c0_13, %c0_14] : memref<1x4x256xf32, #tpu.memory_space<vmem>>, vector<1x4x256xf32>
    tpu.vector_store %arg5[%c0_12, %c0_13, %c0_14], %22 {strides = array<i32>} : memref<1x4x256xf32, #tpu.memory_space<vmem>>, vector<1x4x256xf32>,
    return
  }
  func.func @transform_0(%arg0: i32, %arg1: i32) -> (i32, i32, i32) {
    %c0_i32 = arith.constant 0 : i32
    %c0_i32_0 = arith.constant 0 : i32
    return %arg0, %c0_i32, %arg1 : i32, i32, i32
  }
  func.func @transform_1(%arg0: i32, %arg1: i32) -> (i32, i32, i32) {
    %c0_i32 = arith.constant 0 : i32
    %c0_i32_0 = arith.constant 0 : i32
    %c0_i32_1 = arith.constant 0 : i32
    %c0_i32_2 = arith.constant 0 : i32
    return %c0_i32, %c0_i32_0, %c0_i32_1 : i32, i32, i32
  }
  func.func @transform_2(%arg0: i32, %arg1: i32) -> (i32, i32, i32) {
    %c0_i32 = arith.constant 0 : i32
    %c0_i32_0 = arith.constant 0 : i32
    %c0_i32_1 = arith.constant 0 : i32
    %c0_i32_2 = arith.constant 0 : i32
    return %c0_i32, %c0_i32_0, %c0_i32_1 : i32, i32, i32
  }
  func.func @transform_3(%arg0: i32, %arg1: i32) -> (i32, i32, i32) {
    %c0_i32 = arith.constant 0 : i32
    %c0_i32_0 = arith.constant 0 : i32
    return %arg0, %c0_i32, %arg1 : i32, i32, i32
  }
}

</mosaic_0001>

<bundles_post_ra>
// kernel: tpu_custom_call.1
= control target key start
LH: loop header
LB: loop body
LE: loop exit
PB: predicated region body
PF: predicated region fallthrough
CT: control target
= control target key end

     0   :  { %8 = vsyncpa [#allocation3], 0  ;;  %s804_s0 = inlined_call_operand.hbm [shape: f32[2,4,256], index: 0, kind: input, shape index: {}]   ;;  %s805_s1 = inlined_call_operand.vmem [shape: f32[1,4,1], index: 1, kind: input, shape index: {}]   ;;  %s806_s2 = inlined_call_operand.vmem [shape: f32[1,4,1], index: 2, kind: input, shape index: {}]   ;;  %s807_s3 = inlined_call_operand.hbm [shape: f32[2,4,256], index: 3, kind: output, shape index: {}]  }
   0x1   :  { %10 = vsyncpa [#allocation3 + $0x1], 0 }
   0x2   :  { %11 = vsyncpa [#allocation4], 0 }
   0x3   :  { %13 = vsyncpa [#allocation4 + $0x1], 0  ;;  %s618_s12 = smov 0   ;;  %s620_s13 = smov 0  }
   0x4   :  { %s622_s14 = smov 0   ;;  %s624_s15 = smov 0  }
   0x5   :  { %s626_s16 = smov 0   ;;  %s628_s17 = smov 0  }
   0x6 LB: > { %s393_s18 = sadd.s32 4294967295, %s592_s17   ;;  %s394_s19 = sadd.s32 4294967294, %s592_s17   ;;  %s592_s17 = sphi %s628_s17, %s19_s17   ;;  %s588_s16 = sphi %s626_s16, %s823_s16   ;;  %s584_s15 = sphi %s624_s15, %s822_s15   ;;  %s580_s14 = sphi %s622_s14, %s821_s14   ;;  %s576_s13 = sphi %s620_s13, %s820_s13   ;;  %s572_s12 = sphi %s618_s12, %s819_s12  }
   0x7   : > { %s31_s20 = sadd.s32 1, %s588_s16  ;;  %s40_s21 = sadd.s32 1, %s580_s14 }
   0x8   : > { %p33_p0 = scmp.ge.s32.totalorder %s31_s20, 2  ;;  %p47_p1 = scmp.ne.s32.totalorder %s580_s14, %s576_s13 }
   0x9   : > { %p48_p2 = scmp.eq.s32.totalorder %s592_s17, 0  ;;  %p53_p3 = scmp.ne.s32.totalorder %s576_s13, %s572_s12 }
   0xa   : > { %s825_s20 = smov (%p33_p0, %s31_s20), 0  ;;  %p54_p5 = scmp.eq.s32.totalorder %s393_s18, 0 }
   0xb   : > { %p659_p4 = por %p48_p2, %p47_p1  ;;  %s35_s23 = ssub.s32 %s588_s16, %s825_s20 }
   0xc   : > { %p121_p6 = scmp.eq.s32.totalorder %s393_s18, 1  ;;  %p38_p7 = scmp.eq.s32.totalorder %s35_s23, 0 }
   0xd   : > { %p665_p8 = por %p54_p5, %p53_p3  ;;  %p127_p10 = scmp.eq.s32.totalorder %s394_s19, 1 }
   0xe   : > { %p669_p9 = por %p121_p6, %p47_p1  ;;  %p422_p13 = scmp.lt.s32.totalorder %s592_s17, 2 }
   0xf   : > { %s674_s26 = scalar_select %p38_p7, %s580_s14, %s40_s21  }
  0x10   : > { %s811_s25 = scalar_select %p669_p9, 1, 0 }
  0x11   : > { %p676_p11 = por %p127_p10, %p53_p3  ;;  %s153_s28 = sand.u32 1, %s580_s14  }
  0x12   : > { %s397_s29 = sshll.u32 %s153_s28, 3  ;;  %s408_s30 = sshll.u32 %s588_s16, 7 }
  0x13   : > { %s812_s27 = scalar_select %p676_p11, 1, 0 }
  0x14   : > { %s687_s6 = scalar_lea.hbm %s804_s0, %s408_s30  ;;  %s157_s7 = scalar_lea.vmem [#allocation2], %s397_s29 }
  0x15   : > { %s167_s8 = sshll.u32 %s157_s7, 4  ;;  %p693_p0 = pnand %p422_p13, %p659_p4  ;;  %s689_s8 = int_to_ptr.vmem [resolvable:$true] %s167_s8 }
  0x16   : > { %s154_s10 = scalar_lea.sflag [#allocation3], %s153_s28  ;;  %s480_s11 = scalar_lea.hbm %s687_s6, 128 }
  0x17   : > { %p481_p3 = scmp.ne.s32.totalorder %s687_s6, %s480_s11  ;;  %p482_p5 = pneg %p693_p0 }
  0x18   : > { %s485_s21 = scalar_lea.hbm %s804_s0, 256  ;;  %p486_p4 = scmp.lt.u32.totalorder %s687_s6, %s804_s0 }
  0x19   : > { %p483_p6 = pnand %p482_p5, %p481_p3  ;;  %p487_p10 = scmp.lt.u32.totalorder %s485_s21, %s480_s11 }
  0x1a   : > { %p489_p12 = scmp.lt.u32.totalorder %s480_s11, %s687_s6 }
  0x1b   : > { %p484_p7 = pneg %p483_p6  ;;  %p488_p13 = por %p487_p10, %p486_p4 }
  0x1d   : > { %p490_p1 = por %p489_p12, %p488_p13 }
  0x1f   : > { %p491_p2 = pnand %p490_p1, %p484_p7 }
  0x21   : > { %494 = shalt.err (!%p491_p2)
}
  0x22   : > { %s495_s28 = scalar_lea.vmem %s689_s8, 128  ;;  %s594_s29 = smov [#allocation2]  }
  0x23   : > { %p496_p3 = scmp.ne.s32.totalorder %s689_s8, %s495_s28  ;;  %s500_s30 = sshll.u32 %s594_s29, 4  ;;  %s501_s30 = int_to_ptr.vmem [resolvable:$false] %s500_s30 }
  0x24   : > { %s502_s4 = scalar_lea.vmem %s501_s30, 256  ;;  %p503_p9 = scmp.lt.s32.totalorder %s689_s8, %s501_s30 }
  0x25   : > { %p498_p6 = pnand %p496_p3, %p482_p5  ;;  %p504_p4 = scmp.lt.s32.totalorder %s502_s4, %s495_s28 }
  0x27   : > { %p499_p11 = pneg %p498_p6  ;;  %p505_p10 = por %p504_p4, %p503_p9 }
  0x29   : > { %p506_p12 = pnand %p505_p10, %p499_p11 }
  0x2b   : > { %509 = shalt.err (!%p506_p12)
}
  0x2c   : > { %417 = dma.hbm_to_vmem [thread:$0]  (!%p693_p0), %s687_s6, 128, %s689_s8, %s154_s10  }
  0x2d   : > { %p814_p1 = scmp.lt.s32.totalorder %s592_s17, 3  ;;  %p815_p2 = scmp.ge.s32.totalorder %s592_s17, 1 }
  0x2f   : > { %p173_p5 = pnand %p815_p2, %p814_p1 }
  0x30   : > { %s729_s5 = sand.u32 (!%p173_p5), 1, %s576_s13  }
  0x31   : > { %176 = sbr.rel (%p173_p5) target bundleno = 209 (0xd1), region = 32  ;;  %s401_s7 = sshll.u32 (!%p173_p5), %s729_s5, 3 }
  0x32   : > { %s179_s11 = scalar_lea.sflag (!%p173_p5), [#allocation3], %s729_s5  ;;  %s182_s9 = scalar_lea.vmem (!%p173_p5), [#allocation2], %s401_s7 }
  0x38   : > { %563 = dma.done.wait (%p665_p8), %s179_s11, 128  }
  0x39   : > { %565 = vsyncadd (%p665_p8), %s179_s11, 4294967168  ;;  %v595_v0 = vmov 0   ;;  %v263_v1 = vld [vmem:[%s805_s1] sm:$0xf]  ;;  %vm211_vm0 = vcmask 1043456   ;;  %v271_v45 = vlaneseq  ;;  %s409_s24 = sshll.u32 %s584_s15, 7 }
  0x3a   : > { %474 = vset.pattern.permute.xlu0 %v595_v0  ;;  %v277_v2 = vld [vmem:[%s806_s2] sm:$0xf]  ;;  %v596_v43 = vmov 839922192   ;;  %s204_s19 = scalar_lea.vmem [#allocation5], %s401_s7  ;;  %s755_s28 = scalar_lea.hbm %s807_s3, %s409_s24 }
  0x3b   : > { %266 = vperm.xlu0 %474, %v263_v1   ;;  %v207_v3 = vld [vmem:[%s182_s9] sm:$0xff]  ;;  %v269_v44 = vunpack.c.l.s4 %v596_v43  ;;  %v272_v48 = vshrl.u32 %v271_v45, 7  ;;  %s309_s21 = sshll.u32 %s204_s19, 4  ;;  %s293_s29 = scalar_lea.sflag [#allocation4], %s729_s5  ;;  %s757_s21 = int_to_ptr.vmem [resolvable:$true] %s309_s21 }
  0x3c   : > { %v209_v4 = vcombine.high %v207_v3, %v207_v3  ;;  %v212_v5 = vsel %vm211_vm0, %v207_v3, 0.0  ;;  %s510_s30 = scalar_lea.vmem %s757_s21, 128  ;;  %p816_p9 = scmp.ne.s32.totalorder %s811_s25, 0 }
  0x3d   : > { %v213_v7 = vrot.slane %v212_v5, 4  ;;  %v270_v47 = vunpack.c.0.s8 %v269_v44  ;;  %p511_p8 = scmp.ne.s32.totalorder %s757_s21, %s510_s30  ;;  %s597_s15 = smov [#allocation5]  }
  0x3e   : > { %v219_v6 = vsel %vm211_vm0, %v209_v4, 0.0  ;;  %s514_s4 = sshll.u32 %s597_s15, 4  ;;  %s515_s4 = int_to_ptr.vmem [resolvable:$false] %s514_s4 }
  0x3f   : > { %280 = vperm.xlu0 %474, %v277_v2   ;;  %v220_v8 = vrot.slane %v219_v6, 4  ;;  %v214_v9 = vadd.f32 %v213_v7, %v212_v5  ;;  %v273_v50 = vsub.s32 %v270_v47, %v272_v48  ;;  %p512_p11 = pnand %p511_p8, %p816_p9  ;;  %s516_s7 = scalar_lea.vmem %s515_s4, 256 }
  0x40   : > { %p517_p7 = scmp.lt.s32.totalorder %s757_s21, %s515_s4  ;;  %p518_p13 = scmp.lt.s32.totalorder %s516_s7, %s510_s30 }
  0x41   : > { %v221_v10 = vadd.f32 %v220_v8, %v219_v6  ;;  %v215_v11 = vrot.slane %v214_v9, 2  ;;  %p513_p0 = pneg %p512_p11 }
  0x42   : > { %p519_p3 = por %p518_p13, %p517_p7 }
  0x43   : > { %v222_v12 = vrot.slane %v221_v10, 2  ;;  %v216_v13 = vadd.f32 %v215_v11, %v214_v9 }
  0x44   : > { %p520_p6 = pnand %p519_p3, %p513_p0 }
  0x45   : > { %v223_v14 = vadd.f32 %v222_v12, %v221_v10  ;;  %v217_v15 = vrot.slane %v216_v13, 1 }
  0x47   : > { %v224_v16 = vrot.slane %v223_v14, 1  ;;  %v218_v17 = vadd.f32 %v217_v15, %v216_v13 }
  0x49   : > { %v225_v18 = vadd.f32 %v224_v16, %v223_v14  ;;  %v227_v19 = vmul.f32 0.25, %v218_v17 }
  0x4b   : > { %v228_v20 = vmul.f32 0.25, %v225_v18 }
  0x4d   : > { %v231_v21 = vcombine.low %v227_v19, %v228_v20 }
  0x4f   : > { %v233_v22 = vsub.f32 %v207_v3, %v231_v21 }
  0x51   : > { %v234_v23 = vmul.f32 %v233_v22, %v233_v22 }
  0x53   : > { %v236_v24 = vcombine.high %v234_v23, %v234_v23  ;;  %v238_v25 = vsel %vm211_vm0, %v234_v23, 0.0 }
  0x54   : > { %v239_v27 = vrot.slane %v238_v25, 4 }
  0x55   : > { %v245_v26 = vsel %vm211_vm0, %v236_v24, 0.0 }
  0x56   : > { %v246_v28 = vrot.slane %v245_v26, 4  ;;  %v240_v29 = vadd.f32 %v239_v27, %v238_v25 }
  0x58   : > { %v247_v30 = vadd.f32 %v246_v28, %v245_v26  ;;  %v241_v31 = vrot.slane %v240_v29, 2 }
  0x5a   : > { %v248_v32 = vrot.slane %v247_v30, 2  ;;  %v242_v33 = vadd.f32 %v241_v31, %v240_v29 }
  0x5c   : > { %v249_v34 = vadd.f32 %v248_v32, %v247_v30  ;;  %v243_v35 = vrot.slane %v242_v33, 1 }
  0x5e   : > { %v250_v36 = vrot.slane %v249_v34, 1  ;;  %v244_v37 = vadd.f32 %v243_v35, %v242_v33 }
  0x60   : > { %v251_v38 = vadd.f32 %v250_v36, %v249_v34  ;;  %v252_v39 = vmul.f32 0.25, %v244_v37 }
  0x62   : > { %v253_v40 = vmul.f32 0.25, %v251_v38  ;;  %v254_v41 = vadd.f32 1e-06, %v252_v39 }
  0x64   : > { %v255_v42 = vadd.f32 1e-06, %v253_v40  ;;  %476 = vrsqrt.f32 %v254_v41 }
  0x66   : > { %478 = vrsqrt.f32 %v255_v42 }
  0x6e   : > { %v477_v46 = vpop.eup %476 }
  0x70   : > { %v479_v49 = vpop.eup %478 }
  0x71   : > { %v260_v51 = vcombine.low %v477_v46, %v479_v49 }
  0x73   : > { %v262_v53 = vmul.f32 %v260_v51, %v233_v22 }
  0xba   : > { %v267_v52 = vpop.permute.xlu0 %266 }
  0xbb   : > { %v274_v54 = vrot.slane %v267_v52, %v273_v50 }
  0xbd   : > { %v276_v56 = vmul.f32 %v274_v54, %v262_v53 }
  0xbe   : > { %v281_v55 = vpop.permute.xlu0 %280 }
  0xbf   : > { %v288_v57 = vrot.slane %v281_v55, %v273_v50 }
  0xc1   : > { %v290_v58 = vadd.f32 %v288_v57, %v276_v56 }
  0xc3   : > { %291 = vst [vmem:[%s204_s19] sm:$0xff] %v290_v58 }
  0xc4   : > { %523 = shalt.err (!%p520_p6)
}
  0xc5   : > { %s524_s5 = scalar_lea.hbm %s755_s28, 128  ;;  %s528_s6 = scalar_lea.hbm %s807_s3, 256 }
  0xc6   : > { %p525_p4 = scmp.ne.s32.totalorder %s755_s28, %s524_s5  ;;  %p529_p1 = scmp.lt.u32.totalorder %s755_s28, %s807_s3 }
  0xc7   : > { %p530_p2 = scmp.lt.u32.totalorder %s528_s6, %s524_s5  ;;  %p532_p8 = scmp.lt.u32.totalorder %s524_s5, %s755_s28 }
  0xc8   : > { %p526_p10 = pnand %p525_p4, %p816_p9 }
  0xc9   : > { %p531_p5 = por %p530_p2, %p529_p1 }
  0xca   : > { %p527_p12 = pneg %p526_p10 }
  0xcb   : > { %p533_p11 = por %p532_p8, %p531_p5 }
  0xcd   : > { %p534_p0 = pnand %p533_p11, %p527_p12 }
  0xcf   : > { %537 = shalt.err (!%p534_p0)
}
  0xd0   : > { %412 = dma.vmem_to_hbm [thread:$0]  (%p816_p9), %s757_s21, 128, %s755_s28, %s293_s29  }
  0xd1 PF: > { %s321_s18 = sand.u32 1, %s572_s12   ;;  %p817_p7 = scmp.ne.s32.totalorder %s812_s27, 0 }
  0xd2   : > { %p818_p13 = scmp.ge.s32.totalorder %s592_s17, 2  ;;  %s322_s24 = scalar_lea.sflag [#allocation4], %s321_s18 }
  0xd4   : > { %p419_p3 = pnand %p818_p13, %p817_p7 }
  0xd6   : > { %567 = dma.done.wait (!%p419_p3), %s322_s24, 128  }
  0xd7   : > { %569 = vsyncadd (!%p419_p3), %s322_s24, 4294967168  ;;  %s19_s17 = sadd.s32 1, %s592_s17   ;;  %s819_s12 = smov %s576_s13 }
  0xd8   : > { %p16_p6 = scmp.ge.s32.totalorder %s19_s17, 4   ;;  %s820_s13 = smov %s580_s14 }
  0xd9   : > { %s821_s14 = smov %s674_s26  ;;  %s822_s15 = smov %s588_s16 }
  0xda   : > { %s823_s16 = smov %s825_s20  ;;  %18 = sbr.rel (!%p16_p6) target bundleno = 6 (0x6), region = 77 }
  0xe1   :  { %327 = vsyncpa [#allocation3], 1 }
  0xe2   :  { %329 = vsyncpa [#allocation3 + $0x1], 1 }
  0xe3   :  { %330 = vsyncpa [#allocation4], 1 }
  0xe4   :  { %332 = vsyncpa [#allocation4 + $0x1], 1 }

</bundles_post_ra>
